<compile_context>
chip_gen: v7x
topology: tpu7x:2x2x1
jax: 0.10.0
libtpu: 0.0.40
codegen_flags: <defaults>
</compile_context>

<pallas_src>
import jax
import jax.numpy as jnp
from jax.experimental import pallas as pl
from jax.experimental.pallas import tpu as pltpu


def _round_up(n, m):
    return ((n + m - 1) // m) * m


def _num_tensorcores():
    """2 TensorCores per chip on v7x, 1 on v5e/v6e."""
    try:
        kind = jax.devices()[0].device_kind.lower()
    except Exception:
        return 1
    return 2 if ("v7" in kind or "7x" in kind) else 1


def _choose_batch_tile(batch, compute_dtype):
    """Per-generation batch tile.

    v5e/v6e (1 TC): the grid is a serial loop -> one big step (no per-step
    overhead, no batch padding) unless the batch is huge.
    v7x (2 TCs): an even number of grid steps so both cores get balanced work
    on the "parallel" axis; tile capped so the double-buffered working set
    stays well under the 32 MiB scoped-VMEM default.
    """
    n_tc = _num_tensorcores()
    row_mult = 16 if jnp.dtype(compute_dtype) == jnp.dtype(jnp.bfloat16) else 8
    if n_tc <= 1:
        max_rows = 4096  # x tile + f32 intermediates + out tile << 128 MiB VMEM
        return batch if batch <= max_rows else max_rows
    if batch < 2 * row_mult:
        return batch  # too small to split usefully
    tb = _round_up(max(batch // 2, row_mult), row_mult)  # ~2 balanced steps
    return min(tb, 1024)


def invdyn_mlp_kernel(x_ref, w0_ref, b0_ref, w1_ref, b1_ref, w2_ref, b2_ref, o_ref):
    """One batch tile of the 3-layer MLP.

    Matmuls run on the MXU with f32 accumulation; bias adds (VALU) and tanh
    (EUP) stay in f32.  x is cast to the compute dtype here (in registers),
    not in HBM.  All blocks are either full-array or 8-row aligned.
    """
    cd = w0_ref.dtype  # compute dtype for MXU inputs (bf16 or f32)
    x = x_ref[...].astype(cd)

    h0 = jnp.tanh(
        jnp.dot(x, w0_ref[...], preferred_element_type=jnp.float32) + b0_ref[...]
    )
    h1 = jnp.tanh(
        jnp.dot(h0.astype(cd), w1_ref[...], preferred_element_type=jnp.float32)
        + b1_ref[...]
    )
    o_ref[...] = (
        jnp.dot(h1.astype(cd), w2_ref[...], preferred_element_type=jnp.float32)
        + b2_ref[...]
    ).astype(o_ref.dtype)


def prepare_params(params, compute_dtype=jnp.bfloat16):
    """One-time parameter preparation (do NOT call per forward):
    cast weights to the MXU compute dtype; biases stay f32, shaped (1, out)."""
    w0, b0, w1, b1, w2, b2 = params
    cast_w = lambda a: jnp.asarray(a, compute_dtype)
    cast_b = lambda a: jnp.asarray(a, jnp.float32).reshape(1, -1)
    return (cast_w(w0), cast_b(b0), cast_w(w1), cast_b(b1), cast_w(w2), cast_b(b2))


def _build_call(B_p, tb, in_dim, mlp_w, act_dim, compute_dtype, single_buffer_params):
    def rep(shape):
        if single_buffer_params:
            # Grid-invariant blocks: double-buffering is pure VMEM waste.
            return pl.BlockSpec(shape, lambda i: (0, 0),
                                pipeline_mode=pl.Buffered(1))
        return pl.BlockSpec(shape, lambda i: (0, 0))

    wbytes = jnp.dtype(compute_dtype).itemsize
    n_wparams = in_dim * mlp_w + mlp_w * mlp_w + mlp_w * act_dim
    cost = pl.CostEstimate(
        flops=2 * B_p * n_wparams,
        transcendentals=2 * B_p * mlp_w,
        bytes_accessed=(B_p * in_dim * 4                 # x read (f32)
                        + n_wparams * wbytes             # weights
                        + (2 * mlp_w + act_dim) * 4      # biases (f32)
                        + B_p * act_dim * 4),            # y write (f32)
    )

    return pl.pallas_call(
        invdyn_mlp_kernel,
        out_shape=jax.ShapeDtypeStruct((B_p, act_dim), jnp.float32),
        grid_spec=pltpu.PrefetchScalarGridSpec(
            num_scalar_prefetch=0,
            grid=(B_p // tb,),
            in_specs=[
                pl.BlockSpec((tb, in_dim), lambda i: (i, 0)),  # x tile over batch
                rep((in_dim, mlp_w)),   # w0
                rep((1, mlp_w)),        # b0
                rep((mlp_w, mlp_w)),    # w1
                rep((1, mlp_w)),        # b1
                rep((mlp_w, act_dim)),  # w2
                rep((1, act_dim)),      # b2
            ],
            out_specs=pl.BlockSpec((tb, act_dim), lambda i: (i, 0)),
        ),
        compiler_params=pltpu.CompilerParams(
            dimension_semantics=("parallel",),  # batch axis -> both v7x TCs
        ),
        cost_estimate=cost,
    )


def invdyn_mlp_forward(x, prepped_params, *, tb=None):
    """InvDynMLP.forward via pallas_call, tiled over the batch dimension.

    `prepped_params` must come from prepare_params (computed once)."""
    w0, b0, w1, b1, w2, b2 = prepped_params
    B, in_dim = x.shape
    mlp_w = w0.shape[1]
    act_dim = w2.shape[1]
    compute_dtype = w0.dtype

    if tb is None:
        tb = _choose_batch_tile(B, compute_dtype)

    if tb >= B:
        # Single grid step: block == full array in both dims, no padding at all.
        tb_eff, B_p, x_in = B, B, x
    else:
        tb_eff = _round_up(max(tb, 8), 8)       # f32 sublane rule for the x/out blocks
        B_p = _round_up(B, tb_eff)
        x_in = x if B_p == B else jnp.pad(x, ((0, B_p - B), (0, 0)))

    args = (x_in, w0, b0, w1, b1, w2, b2)
    try:
        out = _build_call(B_p, tb_eff, in_dim, mlp_w, act_dim, compute_dtype,
                          single_buffer_params=True)(*args)
    except Exception:
        # Fallback if this JAX version rejects pipeline_mode=pl.Buffered(1).
        out = _build_call(B_p, tb_eff, in_dim, mlp_w, act_dim, compute_dtype,
                          single_buffer_params=False)(*args)

    return out if B_p == B else out[:B]


def init_params(key, obs_dim, act_dim, mlp_w):
    """Deterministic init mimicking torch.nn.Linear defaults:
    U(-1/sqrt(fan_in), 1/sqrt(fan_in)) for weight and bias; fc2 scaled by 0.01.
    Weights are stored pre-transposed as [in, out]."""
    in_dim = obs_dim * 2
    ks = jax.random.split(key, 6)

    def lin(kw, kb, fan_in, fan_out):
        bound = 1.0 / jnp.sqrt(jnp.float32(fan_in))
        w = jax.random.uniform(kw, (fan_in, fan_out), jnp.float32, -bound, bound)
        b = jax.random.uniform(kb, (1, fan_out), jnp.float32, -bound, bound)
        return w, b

    w0, b0 = lin(ks[0], ks[1], in_dim, mlp_w)
    w1, b1 = lin(ks[2], ks[3], mlp_w, mlp_w)
    w2, b2 = lin(ks[4], ks[5], mlp_w, act_dim)
    return (w0, b0, w1, b1, w2 * 0.01, b2 * 0.01)


def reference_forward(x, params, compute_dtype=jnp.float32):
    """Pure-JAX reference mirroring the kernel's dtype handling
    (compute_dtype MXU inputs, f32 accumulation / bias / tanh)."""
    w0, b0, w1, b1, w2, b2 = params
    cd = compute_dtype
    h = jnp.tanh(
        jnp.dot(x.astype(cd), w0.astype(cd), preferred_element_type=jnp.float32) + b0
    )
    h = jnp.tanh(
        jnp.dot(h.astype(cd), w1.astype(cd), preferred_element_type=jnp.float32) + b1
    )
    return jnp.dot(h.astype(cd), w2.astype(cd), preferred_element_type=jnp.float32) + b2


if __name__ == "__main__":
    # Shapes consistent with the module: obs_dim=24 (pen-v0) -> input dim 48,
    # hidden mlp_w=64 (module default), act_dim=18, batch=32.
    obs_dim, act_dim, mlp_w, batch = 24, 18, 64, 32

    key = jax.random.PRNGKey(0)
    k_params, k_x = jax.random.split(key)
    params = init_params(k_params, obs_dim, act_dim, mlp_w)
    x = jax.random.normal(k_x, (batch, obs_dim * 2), jnp.float32)

    ref_f32 = reference_forward(x, params, jnp.float32)
    ref_bf16 = reference_forward(x, params, jnp.bfloat16)

    # One-time parameter preparation for each compute path.
    prepped_f32 = prepare_params(params, compute_dtype=jnp.float32)
    prepped_bf16 = prepare_params(params, compute_dtype=jnp.bfloat16)

    # Exact f32 path.
    out_f32 = jax.block_until_ready(invdyn_mlp_forward(x, prepped_f32))
    # Default fast path: bf16 MXU inputs, f32 accumulation.
    out_bf16 = jax.block_until_ready(invdyn_mlp_forward(x, prepped_bf16))

    assert out_f32.shape == (batch, act_dim)
    assert out_bf16.shape == (batch, act_dim)
    assert jnp.allclose(out_f32, ref_f32, atol=2e-5, rtol=1e-5)
    assert jnp.allclose(out_bf16, ref_bf16, atol=5e-4, rtol=1e-2)

    print("KERNEL_OK")
</pallas_src>

<mosaic_0001>
module attributes {stable_mosaic.version = 11 : i64} {
  func.func @invdyn_mlp_kernel(%arg0: i32, %arg1: memref<32x48xf32, #tpu.memory_space<vmem>>, %arg2: memref<48x64xf32, #tpu.memory_space<vmem>>, %arg3: memref<1x64xf32, #tpu.memory_space<vmem>>, %arg4: memref<64x64xf32, #tpu.memory_space<vmem>>, %arg5: memref<1x64xf32, #tpu.memory_space<vmem>>, %arg6: memref<64x18xf32, #tpu.memory_space<vmem>>, %arg7: memref<1x18xf32, #tpu.memory_space<vmem>>, %arg8: memref<32x18xf32, #tpu.memory_space<vmem>>) attributes {dimension_semantics = [#tpu.dimension_semantics<parallel>], iteration_bounds = array<i64: 1>, scalar_prefetch = 0 : i64, scratch_operands = 0 : i64, tpu.core_type = #tpu.core_type<tc>, window_params = [{transform_indices = @transform_0, window_bounds = array<i64: 32, 48>}, {pipeline_mode = #tpu.pipeline_mode<synchronous>, transform_indices = @transform_1, window_bounds = array<i64: 48, 64>}, {pipeline_mode = #tpu.pipeline_mode<synchronous>, transform_indices = @transform_2, window_bounds = array<i64: 1, 64>}, {pipeline_mode = #tpu.pipeline_mode<synchronous>, transform_indices = @transform_3, window_bounds = array<i64: 64, 64>}, {pipeline_mode = #tpu.pipeline_mode<synchronous>, transform_indices = @transform_4, window_bounds = array<i64: 1, 64>}, {pipeline_mode = #tpu.pipeline_mode<synchronous>, transform_indices = @transform_5, window_bounds = array<i64: 64, 18>}, {pipeline_mode = #tpu.pipeline_mode<synchronous>, transform_indices = @transform_6, window_bounds = array<i64: 1, 18>}, {transform_indices = @transform_7, window_bounds = array<i64: 32, 18>}]} {
    %c0 = arith.constant 0 : index
    %c0_0 = arith.constant 0 : index
    %0 = vector.load %arg1[%c0, %c0_0] : memref<32x48xf32, #tpu.memory_space<vmem>>, vector<32x48xf32>
    %c0_1 = arith.constant 0 : index
    %c0_2 = arith.constant 0 : index
    %1 = vector.load %arg2[%c0_1, %c0_2] : memref<48x64xf32, #tpu.memory_space<vmem>>, vector<48x64xf32>
    %cst = arith.constant dense<0.000000e+00> : vector<32x64xf32>
    %2 = tpu.matmul %0, %1, %cst {dimension_numbers = #tpu.dot_dimension_numbers<[1], [0], [0], [1], [0, 0, 1, 1], [], []>} : vector<32x48xf32>, vector<48x64xf32>, vector<32x64xf32> -> vector<32x64xf32>
    %c0_3 = arith.constant 0 : index
    %c0_4 = arith.constant 0 : index
    %3 = vector.load %arg3[%c0_3, %c0_4] : memref<1x64xf32, #tpu.memory_space<vmem>>, vector<1x64xf32>
    %4 = vector.broadcast %3 : vector<1x64xf32> to vector<32x64xf32>
    %5 = arith.addf %2, %4 : vector<32x64xf32>
    %6 = math.tanh %5 : vector<32x64xf32>
    %c0_5 = arith.constant 0 : index
    %c0_6 = arith.constant 0 : index
    %7 = vector.load %arg4[%c0_5, %c0_6] : memref<64x64xf32, #tpu.memory_space<vmem>>, vector<64x64xf32>
    %cst_7 = arith.constant dense<0.000000e+00> : vector<32x64xf32>
    %8 = tpu.matmul %6, %7, %cst_7 {dimension_numbers = #tpu.dot_dimension_numbers<[1], [0], [0], [1], [0, 0, 1, 1], [], []>} : vector<32x64xf32>, vector<64x64xf32>, vector<32x64xf32> -> vector<32x64xf32>
    %c0_8 = arith.constant 0 : index
    %c0_9 = arith.constant 0 : index
    %9 = vector.load %arg5[%c0_8, %c0_9] : memref<1x64xf32, #tpu.memory_space<vmem>>, vector<1x64xf32>
    %10 = vector.broadcast %9 : vector<1x64xf32> to vector<32x64xf32>
    %11 = arith.addf %8, %10 : vector<32x64xf32>
    %12 = math.tanh %11 : vector<32x64xf32>
    %c0_10 = arith.constant 0 : index
    %c0_11 = arith.constant 0 : index
    %13 = vector.load %arg6[%c0_10, %c0_11] : memref<64x18xf32, #tpu.memory_space<vmem>>, vector<64x18xf32>
    %cst_12 = arith.constant dense<0.000000e+00> : vector<32x18xf32>
    %14 = tpu.matmul %12, %13, %cst_12 {dimension_numbers = #tpu.dot_dimension_numbers<[1], [0], [0], [1], [0, 0, 1, 1], [], []>} : vector<32x64xf32>, vector<64x18xf32>, vector<32x18xf32> -> vector<32x18xf32>
    %c0_13 = arith.constant 0 : index
    %c0_14 = arith.constant 0 : index
    %15 = vector.load %arg7[%c0_13, %c0_14] : memref<1x18xf32, #tpu.memory_space<vmem>>, vector<1x18xf32>
    %16 = vector.broadcast %15 : vector<1x18xf32> to vector<32x18xf32>
    %17 = arith.addf %14, %16 : vector<32x18xf32>
    %c0_15 = arith.constant 0 : index
    %c0_16 = arith.constant 0 : index
    %18 = vector.load %arg8[%c0_15, %c0_16] : memref<32x18xf32, #tpu.memory_space<vmem>>, vector<32x18xf32>
    tpu.vector_store %arg8[%c0_15, %c0_16], %17 {strides = array<i32>} : memref<32x18xf32, #tpu.memory_space<vmem>>, vector<32x18xf32>,
    return
  }
  func.func @transform_0(%arg0: i32) -> (i32, i32) {
    %c0_i32 = arith.constant 0 : i32
    %c0_i32_0 = arith.constant 0 : i32
    return %arg0, %c0_i32 : i32, i32
  }
  func.func @transform_1(%arg0: i32) -> (i32, i32) {
    %c0_i32 = arith.constant 0 : i32
    %c0_i32_0 = arith.constant 0 : i32
    %c0_i32_1 = arith.constant 0 : i32
    return %c0_i32, %c0_i32_0 : i32, i32
  }
  func.func @transform_2(%arg0: i32) -> (i32, i32) {
    %c0_i32 = arith.constant 0 : i32
    %c0_i32_0 = arith.constant 0 : i32
    %c0_i32_1 = arith.constant 0 : i32
    return %c0_i32, %c0_i32_0 : i32, i32
  }
  func.func @transform_3(%arg0: i32) -> (i32, i32) {
    %c0_i32 = arith.constant 0 : i32
    %c0_i32_0 = arith.constant 0 : i32
    %c0_i32_1 = arith.constant 0 : i32
    return %c0_i32, %c0_i32_0 : i32, i32
  }
  func.func @transform_4(%arg0: i32) -> (i32, i32) {
    %c0_i32 = arith.constant 0 : i32
    %c0_i32_0 = arith.constant 0 : i32
    %c0_i32_1 = arith.constant 0 : i32
    return %c0_i32, %c0_i32_0 : i32, i32
  }
  func.func @transform_5(%arg0: i32) -> (i32, i32) {
    %c0_i32 = arith.constant 0 : i32
    %c0_i32_0 = arith.constant 0 : i32
    %c0_i32_1 = arith.constant 0 : i32
    return %c0_i32, %c0_i32_0 : i32, i32
  }
  func.func @transform_6(%arg0: i32) -> (i32, i32) {
    %c0_i32 = arith.constant 0 : i32
    %c0_i32_0 = arith.constant 0 : i32
    %c0_i32_1 = arith.constant 0 : i32
    return %c0_i32, %c0_i32_0 : i32, i32
  }
  func.func @transform_7(%arg0: i32) -> (i32, i32) {
    %c0_i32 = arith.constant 0 : i32
    %c0_i32_0 = arith.constant 0 : i32
    return %arg0, %c0_i32 : i32, i32
  }
}

module attributes {stable_mosaic.version = 11 : i64} {
  func.func @invdyn_mlp_kernel(%arg0: i32, %arg1: memref<32x48xf32, #tpu.memory_space<vmem>>, %arg2: memref<48x64xf32, #tpu.memory_space<vmem>>, %arg3: memref<1x64xf32, #tpu.memory_space<vmem>>, %arg4: memref<64x64xf32, #tpu.memory_space<vmem>>, %arg5: memref<1x64xf32, #tpu.memory_space<vmem>>, %arg6: memref<64x18xf32, #tpu.memory_space<vmem>>, %arg7: memref<1x18xf32, #tpu.memory_space<vmem>>, %arg8: memref<32x18xf32, #tpu.memory_space<vmem>>) attributes {dimension_semantics = [#tpu.dimension_semantics<parallel>], iteration_bounds = array<i64: 1>, scalar_prefetch = 0 : i64, scratch_operands = 0 : i64, tpu.core_type = #tpu.core_type<tc>, window_params = [{transform_indices = @transform_0, window_bounds = array<i64: 32, 48>}, {pipeline_mode = #tpu.pipeline_mode<synchronous>, transform_indices = @transform_1, window_bounds = array<i64: 48, 64>}, {pipeline_mode = #tpu.pipeline_mode<synchronous>, transform_indices = @transform_2, window_bounds = array<i64: 1, 64>}, {pipeline_mode = #tpu.pipeline_mode<synchronous>, transform_indices = @transform_3, window_bounds = array<i64: 64, 64>}, {pipeline_mode = #tpu.pipeline_mode<synchronous>, transform_indices = @transform_4, window_bounds = array<i64: 1, 64>}, {pipeline_mode = #tpu.pipeline_mode<synchronous>, transform_indices = @transform_5, window_bounds = array<i64: 64, 18>}, {pipeline_mode = #tpu.pipeline_mode<synchronous>, transform_indices = @transform_6, window_bounds = array<i64: 1, 18>}, {transform_indices = @transform_7, window_bounds = array<i64: 32, 18>}]} {
    %c0 = arith.constant 0 : index
    %c0_0 = arith.constant 0 : index
    %0 = vector.load %arg1[%c0, %c0_0] : memref<32x48xf32, #tpu.memory_space<vmem>>, vector<32x48xf32>
    %c0_1 = arith.constant 0 : index
    %c0_2 = arith.constant 0 : index
    %1 = vector.load %arg2[%c0_1, %c0_2] : memref<48x64xf32, #tpu.memory_space<vmem>>, vector<48x64xf32>
    %cst = arith.constant dense<0.000000e+00> : vector<32x64xf32>
    %2 = tpu.matmul %0, %1, %cst {dimension_numbers = #tpu.dot_dimension_numbers<[1], [0], [0], [1], [0, 0, 1, 1], [], []>} : vector<32x48xf32>, vector<48x64xf32>, vector<32x64xf32> -> vector<32x64xf32>
    %c0_3 = arith.constant 0 : index
    %c0_4 = arith.constant 0 : index
    %3 = vector.load %arg3[%c0_3, %c0_4] : memref<1x64xf32, #tpu.memory_space<vmem>>, vector<1x64xf32>
    %4 = vector.broadcast %3 : vector<1x64xf32> to vector<32x64xf32>
    %5 = arith.addf %2, %4 : vector<32x64xf32>
    %6 = math.tanh %5 : vector<32x64xf32>
    %c0_5 = arith.constant 0 : index
    %c0_6 = arith.constant 0 : index
    %7 = vector.load %arg4[%c0_5, %c0_6] : memref<64x64xf32, #tpu.memory_space<vmem>>, vector<64x64xf32>
    %cst_7 = arith.constant dense<0.000000e+00> : vector<32x64xf32>
    %8 = tpu.matmul %6, %7, %cst_7 {dimension_numbers = #tpu.dot_dimension_numbers<[1], [0], [0], [1], [0, 0, 1, 1], [], []>} : vector<32x64xf32>, vector<64x64xf32>, vector<32x64xf32> -> vector<32x64xf32>
    %c0_8 = arith.constant 0 : index
    %c0_9 = arith.constant 0 : index
    %9 = vector.load %arg5[%c0_8, %c0_9] : memref<1x64xf32, #tpu.memory_space<vmem>>, vector<1x64xf32>
    %10 = vector.broadcast %9 : vector<1x64xf32> to vector<32x64xf32>
    %11 = arith.addf %8, %10 : vector<32x64xf32>
    %12 = math.tanh %11 : vector<32x64xf32>
    %c0_10 = arith.constant 0 : index
    %c0_11 = arith.constant 0 : index
    %13 = vector.load %arg6[%c0_10, %c0_11] : memref<64x18xf32, #tpu.memory_space<vmem>>, vector<64x18xf32>
    %cst_12 = arith.constant dense<0.000000e+00> : vector<32x18xf32>
    %14 = tpu.matmul %12, %13, %cst_12 {dimension_numbers = #tpu.dot_dimension_numbers<[1], [0], [0], [1], [0, 0, 1, 1], [], []>} : vector<32x64xf32>, vector<64x18xf32>, vector<32x18xf32> -> vector<32x18xf32>
    %c0_13 = arith.constant 0 : index
    %c0_14 = arith.constant 0 : index
    %15 = vector.load %arg7[%c0_13, %c0_14] : memref<1x18xf32, #tpu.memory_space<vmem>>, vector<1x18xf32>
    %16 = vector.broadcast %15 : vector<1x18xf32> to vector<32x18xf32>
    %17 = arith.addf %14, %16 : vector<32x18xf32>
    %c0_15 = arith.constant 0 : index
    %c0_16 = arith.constant 0 : index
    %18 = vector.load %arg8[%c0_15, %c0_16] : memref<32x18xf32, #tpu.memory_space<vmem>>, vector<32x18xf32>
    tpu.vector_store %arg8[%c0_15, %c0_16], %17 {strides = array<i32>} : memref<32x18xf32, #tpu.memory_space<vmem>>, vector<32x18xf32>,
    return
  }
  func.func @transform_0(%arg0: i32) -> (i32, i32) {
    %c0_i32 = arith.constant 0 : i32
    %c0_i32_0 = arith.constant 0 : i32
    return %arg0, %c0_i32 : i32, i32
  }
  func.func @transform_1(%arg0: i32) -> (i32, i32) {
    %c0_i32 = arith.constant 0 : i32
    %c0_i32_0 = arith.constant 0 : i32
    %c0_i32_1 = arith.constant 0 : i32
    return %c0_i32, %c0_i32_0 : i32, i32
  }
  func.func @transform_2(%arg0: i32) -> (i32, i32) {
    %c0_i32 = arith.constant 0 : i32
    %c0_i32_0 = arith.constant 0 : i32
    %c0_i32_1 = arith.constant 0 : i32
    return %c0_i32, %c0_i32_0 : i32, i32
  }
  func.func @transform_3(%arg0: i32) -> (i32, i32) {
    %c0_i32 = arith.constant 0 : i32
    %c0_i32_0 = arith.constant 0 : i32
    %c0_i32_1 = arith.constant 0 : i32
    return %c0_i32, %c0_i32_0 : i32, i32
  }
  func.func @transform_4(%arg0: i32) -> (i32, i32) {
    %c0_i32 = arith.constant 0 : i32
    %c0_i32_0 = arith.constant 0 : i32
    %c0_i32_1 = arith.constant 0 : i32
    return %c0_i32, %c0_i32_0 : i32, i32
  }
  func.func @transform_5(%arg0: i32) -> (i32, i32) {
    %c0_i32 = arith.constant 0 : i32
    %c0_i32_0 = arith.constant 0 : i32
    %c0_i32_1 = arith.constant 0 : i32
    return %c0_i32, %c0_i32_0 : i32, i32
  }
  func.func @transform_6(%arg0: i32) -> (i32, i32) {
    %c0_i32 = arith.constant 0 : i32
    %c0_i32_0 = arith.constant 0 : i32
    %c0_i32_1 = arith.constant 0 : i32
    return %c0_i32, %c0_i32_0 : i32, i32
  }
  func.func @transform_7(%arg0: i32) -> (i32, i32) {
    %c0_i32 = arith.constant 0 : i32
    %c0_i32_0 = arith.constant 0 : i32
    return %arg0, %c0_i32 : i32, i32
  }
}

</mosaic_0001>

<bundles_post_ra>
// kernel: tpu_custom_call.1
= control target key start
LH: loop header
LB: loop body
LE: loop exit
PB: predicated region body
PF: predicated region fallthrough
CT: control target
= control target key end

     0   :  { %12 = vsyncpa [#allocation3], 0  ;;  %s596_s24 = smov [#allocation2]   ;;  %s744_s0 = inlined_call_operand.vmem [shape: f32[32,48], index: 0, kind: input, shape index: {}]   ;;  %s745_s1 = inlined_call_operand.hbm [shape: f32[48,64], index: 1, kind: input, shape index: {}]   ;;  %s746_s2 = inlined_call_operand.vmem [shape: f32[1,64], index: 2, kind: input, shape index: {}]   ;;  %s747_s3 = inlined_call_operand.vmem [shape: f32[64,64], index: 3, kind: input, shape index: {}]   ;;  %s748_s4 = inlined_call_operand.vmem [shape: f32[1,64], index: 4, kind: input, shape index: {}]   ;;  %s749_s5 = inlined_call_operand.vmem [shape: f32[64,18], index: 5, kind: input, shape index: {}]   ;;  %s750_s6 = inlined_call_operand.vmem [shape: f32[1,18], index: 6, kind: input, shape index: {}]   ;;  %s751_s7 = inlined_call_operand.vmem [shape: f32[32,18], index: 7, kind: output, shape index: {}]  }
   0x1   :  { %s20_s25 = sshll.u32 %s596_s24, 4  ;;  %s572_s28 = scalar_lea.hbm %s745_s1, 768  ;;  %s21_s25 = int_to_ptr.vmem [resolvable:$true] %s20_s25 }
   0x2   :  { %p573_p0 = scmp.ne.s32.totalorder %s745_s1, %s572_s28  ;;  %p576_p1 = scmp.lt.u32.totalorder %s572_s28, %s745_s1 }
   0x4   :  { %p578_p2 = pnand %p576_p1, %p573_p0 }
   0x6   :  { %581 = shalt.err (!%p578_p2)
}
   0x7   :  { %s582_s10 = scalar_lea.vmem %s21_s25, 768  ;;  %p587_p4 = scmp.lt.s32.totalorder %s21_s25, %s21_s25 }
   0x8   :  { %p583_p3 = scmp.ne.s32.totalorder %s21_s25, %s582_s10  ;;  %p588_p5 = scmp.lt.s32.totalorder %s582_s10, %s582_s10 }
   0xa   :  { %p589_p6 = por %p588_p5, %p587_p4 }
   0xc   :  { %p590_p7 = pnand %p589_p6, %p583_p3 }
   0xe   :  { %593 = shalt.err (!%p590_p7)
}
   0xf   :  { %s597_s11 = smov 128   ;;  %s598_s12 = smov 8  }
  0x10   :  { %26 = dma.hbm_to_vmem [thread:$0]  %s745_s1, 768, %s21_s25, [#allocation3], %s597_s11, %s597_s11, %s598_s12  }
  0x11   :  { %594 = dma.done.wait [#allocation3], 768  }
  0x12   :  { %595 = vsyncadd [#allocation3], 4294966528  ;;  %v44_v0 = vld [vmem:[#allocation2] sm:$0xff]  ;;  %v45_v1 = vld [vmem:[#allocation2 + $0x8] sm:$0xff]  ;;  %vm57_vm0 = vcmask 392192   ;;  %vm174_vm1 = vcmask 523264  }
  0x13   :  { %v46_v2 = vld [vmem:[#allocation2 + $0x10] sm:$0xff]  ;;  %v509_v3 = vpack.c.bf16 %v45_v1, %v44_v0  ;;  %v47_v4 = vld [vmem:[#allocation2 + $0x18] sm:$0xff]  ;;  %v48_v6 = vld [vmem:[#allocation2 + $0x20] sm:$0xff]  ;;  %vm388_vm2 = vcmask 146432  }
  0x14   :  { %v513_v5 = vpack.c.bf16 %v47_v4, %v46_v2  ;;  %v49_v7 = vld [vmem:[#allocation2 + $0x28] sm:$0xff]  ;;  %v40_v8 = vld [vmem:[%s744_s0] sm:$0xff]  ;;  %v42_v11 = vld [vmem:[%s744_s0 + $0x10] sm:$0xff] }
  0x15   :  { %510 = vmatprep.subr.bf16.mxu0 %v509_v3  ;;  %459 = vmatprep.mubr.msk.f32.mxu0 %vm57_vm0, %v40_v8  ;;  %v517_v9 = vpack.c.bf16 %v49_v7, %v48_v6  ;;  %v41_v10 = vld [vmem:[%s744_s0 + $0x8] sm:$0xff]  ;;  %v43_v12 = vld [vmem:[%s744_s0 + $0x18] sm:$0xff]  ;;  %v159_v13 = vld [vmem:[%s747_s3] sm:$0xff] }
  0x16   :  { %512 = vmatpush3.bf16.msra.mxu0 %v509_v3  ;;  %v160_v14 = vld [vmem:[%s747_s3 + $0x8] sm:$0xff]  ;;  %v161_v16 = vld [vmem:[%s747_s3 + $0x10] sm:$0xff]  ;;  %v162_v17 = vld [vmem:[%s747_s3 + $0x18] sm:$0xff] }
  0x17   :  { %514 = vmatprep.subr.bf16.mxu0 %v513_v5  ;;  %v521_v15 = vpack.c.bf16 %v160_v14, %v159_v13  ;;  %v525_v18 = vpack.c.bf16 %v162_v17, %v161_v16  ;;  %v163_v19 = vld [vmem:[%s747_s3 + $0x20] sm:$0xff]  ;;  %v164_v20 = vld [vmem:[%s747_s3 + $0x28] sm:$0xff]  ;;  %v165_v22 = vld [vmem:[%s747_s3 + $0x30] sm:$0xff] }
  0x18   :  { %v529_v21 = vpack.c.bf16 %v164_v20, %v163_v19  ;;  %v166_v23 = vld [vmem:[%s747_s3 + $0x38] sm:$0xff]  ;;  %v398_v25 = vld [vmem:[%s746_s2] ss:$0 sm:$0xff]  ;;  %v277_v39 = vld [vmem:[%s749_s5 + $0x8] sm:$0xff] }
  0x19   :  { %522 = vmatprep.subr.bf16.mxu1 %v521_v15  ;;  %v533_v24 = vpack.c.bf16 %v166_v23, %v165_v22  ;;  %v276_v38 = vld [vmem:[%s749_s5] sm:$0xff]  ;;  %v278_v41 = vld [vmem:[%s749_s5 + $0x10] sm:$0xff]  ;;  %v279_v42 = vld [vmem:[%s749_s5 + $0x18] sm:$0xff] }
  0x1a   :  { %516 = vmatpush3.bf16.msra.mxu0 %v513_v5  ;;  %524 = vmatpush3.bf16.msra.mxu1 %v521_v15  ;;  %v537_v40 = vpack.c.bf16 %v277_v39, %v276_v38  ;;  %v541_v43 = vpack.c.bf16 %v279_v42, %v278_v41  ;;  %v280_v44 = vld [vmem:[%s749_s5 + $0x20] sm:$0xff]  ;;  %v281_v45 = vld [vmem:[%s749_s5 + $0x28] sm:$0xff]  ;;  %v282_v47 = vld [vmem:[%s749_s5 + $0x30] sm:$0xff] }
  0x1b   :  { %518 = vmatprep.subr.bf16.mxu0 %v517_v9  ;;  %526 = vmatprep.subr.bf16.mxu1 %v525_v18  ;;  %v545_v46 = vpack.c.bf16 %v281_v45, %v280_v44  ;;  %v283_v48 = vld [vmem:[%s749_s5 + $0x38] sm:$0xff]  ;;  %v403_v50 = vld [vmem:[%s748_s4] ss:$0 sm:$0xff] }
  0x1c   :  { %v549_v49 = vpack.c.bf16 %v283_v48, %v282_v47  ;;  %v408_v63 = vld [vmem:[%s750_s6] ss:$0 sm:$0xff] }
  0x1e   :  { %520 = vmatpush3.bf16.msra.mxu0 %v517_v9  ;;  %528 = vmatpush3.bf16.msra.mxu1 %v525_v18 }
  0x1f   :  { %530 = vmatprep.subr.bf16.mxu1 %v529_v21  ;;  %538 = vmatprep.subr.bf16.mxu0 %v537_v40 }
  0x21   :  { %460 = vmatmul.mubr.msk.f32.vlgmr.msra.gmra.mrb[0].mxu0 %vm57_vm0, %v41_v10 }
  0x22   :  { %462 = vmatprep.mubr.msk.f32.mxu0 %vm57_vm0, %v42_v11  ;;  %532 = vmatpush3.bf16.msra.mxu1 %v529_v21 }
  0x23   :  { %534 = vmatprep.subr.bf16.mxu1 %v533_v24  ;;  %540 = vmatpush3.bf16.msra.mxu0 %v537_v40 }
  0x24   :  { %542 = vmatprep.subr.bf16.mxu0 %v541_v43 }
  0x25   :  { %463 = vmatmul.mubr.msk.f32.gmra.mrb[2].mxu0 %vm57_vm0, %v43_v12 }
  0x26   :  { %536 = vmatpush3.bf16.msra.mxu1 %v533_v24 }
  0x27   :  { %544 = vmatpush3.bf16.msra.mxu0 %v541_v43 }
  0x28   :  { %546 = vmatprep.subr.bf16.mxu0 %v545_v46 }
  0x2b   :  { %548 = vmatpush3.bf16.msra.mxu0 %v545_v46 }
  0x2c   :  { %550 = vmatprep.subr.bf16.mxu0 %v549_v49 }
  0x2f   :  { %552 = vmatpush3.bf16.msra.mxu0 %v549_v49 }
  0xf4   :  { %v461_v26 = vpop.f32.mrb[0].mxu0 }
  0xf5   :  { %v142_v27 = vadd.f32 %v461_v26, %v398_v25  ;;  %v136_v28 = vpop.f32.mrb[1].mxu0 }
  0xf6   :  { %v137_v29 = vadd.f32 %v398_v25, %v136_v28 }
  0xf8   :  { %556 = vtanh.f32 %v137_v29  ;;  %v464_v30 = vpop.f32.mrb[2].mxu0 }
  0xf9   :  { %558 = vtanh.f32 %v142_v27  ;;  %v152_v31 = vadd.f32 %v464_v30, %v398_v25  ;;  %v146_v32 = vpop.f32.mrb[3].mxu0 }
  0xfa   :  { %v147_v33 = vadd.f32 %v398_v25, %v146_v32 }
  0xfc   :  { %560 = vtanh.f32 %v147_v33 }
  0xfd   :  { %562 = vtanh.f32 %v152_v31 }
 0x102   :  { %v557_v34 = vpop.eup %556 }
 0x103   :  { %v559_v35 = vpop.eup %558  ;;  %481 = vmatprep.mubr.msk.f32.mxu1 %vm174_vm1, %v557_v34 }
 0x104   :  { %482 = vmatmul.mubr.msk.f32.vlgmr.msra.gmra.mrb[0].mxu1 %vm174_vm1, %v559_v35 }
 0x106   :  { %v561_v36 = vpop.eup %560 }
 0x107   :  { %v563_v37 = vpop.eup %562  ;;  %484 = vmatprep.mubr.msk.f32.mxu1 %vm174_vm1, %v561_v36 }
 0x108   :  { %485 = vmatmul.mubr.msk.f32.gmra.mrb[2].mxu1 %vm174_vm1, %v563_v37 }
 0x1d7   :  { %v483_v51 = vpop.f32.mrb[0].mxu1 }
 0x1d8   :  { %v259_v52 = vadd.f32 %v483_v51, %v403_v50  ;;  %v253_v53 = vpop.f32.mrb[1].mxu1 }
 0x1d9   :  { %v254_v54 = vadd.f32 %v403_v50, %v253_v53 }
 0x1db   :  { %564 = vtanh.f32 %v254_v54  ;;  %v486_v55 = vpop.f32.mrb[2].mxu1 }
 0x1dc   :  { %566 = vtanh.f32 %v259_v52  ;;  %v269_v56 = vadd.f32 %v486_v55, %v403_v50  ;;  %v263_v57 = vpop.f32.mrb[3].mxu1 }
 0x1dd   :  { %v264_v58 = vadd.f32 %v403_v50, %v263_v57 }
 0x1df   :  { %568 = vtanh.f32 %v264_v58 }
 0x1e0   :  { %570 = vtanh.f32 %v269_v56 }
 0x1e5   :  { %v565_v59 = vpop.eup %564 }
 0x1e6   :  { %v567_v60 = vpop.eup %566  ;;  %503 = vmatprep.mubr.msk.f32.mxu0 %vm174_vm1, %v565_v59 }
 0x1e7   :  { %504 = vmatmul.mubr.msk.f32.vlgmr.msra.gmra.mrb[4].mxu0 %vm174_vm1, %v567_v60 }
 0x1e9   :  { %v569_v61 = vpop.eup %568 }
 0x1ea   :  { %v571_v62 = vpop.eup %570  ;;  %506 = vmatprep.mubr.msk.f32.mxu0 %vm174_vm1, %v569_v61 }
 0x1eb   :  { %507 = vmatmul.mubr.msk.f32.gmra.mrb[6].mxu0 %vm174_vm1, %v571_v62 }
 0x2ba   :  { %v505_v0 = vpop.f32.mrb[4].mxu0 }
 0x2bb   :  { %v375_v1 = vadd.f32 %v505_v0, %v408_v63  ;;  %v369_v2 = vpop.f32.mrb[5].mxu0 }
 0x2bc   :  { %v370_v3 = vadd.f32 %v408_v63, %v369_v2 }
 0x2bd   :  { %390 = vst.msk [vmem:[%s751_s7 + $0x8] sm:$0xff] %vm388_vm2, %v375_v1 }
 0x2be   :  { %389 = vst.msk [vmem:[%s751_s7] sm:$0xff] %vm388_vm2, %v370_v3  ;;  %v508_v4 = vpop.f32.mrb[6].mxu0 }
 0x2bf   :  { %v385_v5 = vadd.f32 %v508_v4, %v408_v63  ;;  %v379_v6 = vpop.f32.mrb[7].mxu0 }
 0x2c0   :  { %v380_v7 = vadd.f32 %v408_v63, %v379_v6 }
 0x2c1   :  { %392 = vst.msk [vmem:[%s751_s7 + $0x18] sm:$0xff] %vm388_vm2, %v385_v5 }
 0x2c2   :  { %391 = vst.msk [vmem:[%s751_s7 + $0x10] sm:$0xff] %vm388_vm2, %v380_v7 }
 0x2c3   :  { %397 = vsyncpa [#allocation3], 1 }

// kernel: tpu_custom_call.1
= control target key start
LH: loop header
LB: loop body
LE: loop exit
PB: predicated region body
PF: predicated region fallthrough
CT: control target
= control target key end

     0   :  { %12 = vsyncpa [#allocation3], 0  ;;  %s596_s24 = smov [#allocation2]   ;;  %s744_s0 = inlined_call_operand.vmem [shape: f32[32,48], index: 0, kind: input, shape index: {}]   ;;  %s745_s1 = inlined_call_operand.hbm [shape: f32[48,64], index: 1, kind: input, shape index: {}]   ;;  %s746_s2 = inlined_call_operand.vmem [shape: f32[1,64], index: 2, kind: input, shape index: {}]   ;;  %s747_s3 = inlined_call_operand.vmem [shape: f32[64,64], index: 3, kind: input, shape index: {}]   ;;  %s748_s4 = inlined_call_operand.vmem [shape: f32[1,64], index: 4, kind: input, shape index: {}]   ;;  %s749_s5 = inlined_call_operand.vmem [shape: f32[64,18], index: 5, kind: input, shape index: {}]   ;;  %s750_s6 = inlined_call_operand.vmem [shape: f32[1,18], index: 6, kind: input, shape index: {}]   ;;  %s751_s7 = inlined_call_operand.vmem [shape: f32[32,18], index: 7, kind: output, shape index: {}]  }
   0x1   :  { %s20_s25 = sshll.u32 %s596_s24, 4  ;;  %s572_s28 = scalar_lea.hbm %s745_s1, 768  ;;  %s21_s25 = int_to_ptr.vmem [resolvable:$true] %s20_s25 }
   0x2   :  { %p573_p0 = scmp.ne.s32.totalorder %s745_s1, %s572_s28  ;;  %p576_p1 = scmp.lt.u32.totalorder %s572_s28, %s745_s1 }
   0x4   :  { %p578_p2 = pnand %p576_p1, %p573_p0 }
   0x6   :  { %581 = shalt.err (!%p578_p2)
}
   0x7   :  { %s582_s10 = scalar_lea.vmem %s21_s25, 768  ;;  %p587_p4 = scmp.lt.s32.totalorder %s21_s25, %s21_s25 }
   0x8   :  { %p583_p3 = scmp.ne.s32.totalorder %s21_s25, %s582_s10  ;;  %p588_p5 = scmp.lt.s32.totalorder %s582_s10, %s582_s10 }
   0xa   :  { %p589_p6 = por %p588_p5, %p587_p4 }
   0xc   :  { %p590_p7 = pnand %p589_p6, %p583_p3 }
   0xe   :  { %593 = shalt.err (!%p590_p7)
}
   0xf   :  { %s597_s11 = smov 128   ;;  %s598_s12 = smov 8  }
  0x10   :  { %26 = dma.hbm_to_vmem [thread:$0]  %s745_s1, 768, %s21_s25, [#allocation3], %s597_s11, %s597_s11, %s598_s12  }
  0x11   :  { %594 = dma.done.wait [#allocation3], 768  }
  0x12   :  { %595 = vsyncadd [#allocation3], 4294966528  ;;  %v44_v0 = vld [vmem:[#allocation2] sm:$0xff]  ;;  %v45_v1 = vld [vmem:[#allocation2 + $0x8] sm:$0xff]  ;;  %vm57_vm0 = vcmask 392192   ;;  %vm174_vm1 = vcmask 523264  }
  0x13   :  { %v46_v2 = vld [vmem:[#allocation2 + $0x10] sm:$0xff]  ;;  %v509_v3 = vpack.c.bf16 %v45_v1, %v44_v0  ;;  %v47_v4 = vld [vmem:[#allocation2 + $0x18] sm:$0xff]  ;;  %v48_v6 = vld [vmem:[#allocation2 + $0x20] sm:$0xff]  ;;  %vm388_vm2 = vcmask 146432  }
  0x14   :  { %v513_v5 = vpack.c.bf16 %v47_v4, %v46_v2  ;;  %v49_v7 = vld [vmem:[#allocation2 + $0x28] sm:$0xff]  ;;  %v40_v8 = vld [vmem:[%s744_s0] sm:$0xff]  ;;  %v42_v11 = vld [vmem:[%s744_s0 + $0x10] sm:$0xff] }
  0x15   :  { %510 = vmatprep.subr.bf16.mxu0 %v509_v3  ;;  %459 = vmatprep.mubr.msk.f32.mxu0 %vm57_vm0, %v40_v8  ;;  %v517_v9 = vpack.c.bf16 %v49_v7, %v48_v6  ;;  %v41_v10 = vld [vmem:[%s744_s0 + $0x8] sm:$0xff]  ;;  %v43_v12 = vld [vmem:[%s744_s0 + $0x18] sm:$0xff]  ;;  %v159_v13 = vld [vmem:[%s747_s3] sm:$0xff] }
  0x16   :  { %512 = vmatpush3.bf16.msra.mxu0 %v509_v3  ;;  %v160_v14 = vld [vmem:[%s747_s3 + $0x8] sm:$0xff]  ;;  %v161_v16 = vld [vmem:[%s747_s3 + $0x10] sm:$0xff]  ;;  %v162_v17 = vld [vmem:[%s747_s3 + $0x18] sm:$0xff] }
  0x17   :  { %514 = vmatprep.subr.bf16.mxu0 %v513_v5  ;;  %v521_v15 = vpack.c.bf16 %v160_v14, %v159_v13  ;;  %v525_v18 = vpack.c.bf16 %v162_v17, %v161_v16  ;;  %v163_v19 = vld [vmem:[%s747_s3 + $0x20] sm:$0xff]  ;;  %v164_v20 = vld [vmem:[%s747_s3 + $0x28] sm:$0xff]  ;;  %v165_v22 = vld [vmem:[%s747_s3 + $0x30] sm:$0xff] }
  0x18   :  { %v529_v21 = vpack.c.bf16 %v164_v20, %v163_v19  ;;  %v166_v23 = vld [vmem:[%s747_s3 + $0x38] sm:$0xff]  ;;  %v398_v25 = vld [vmem:[%s746_s2] ss:$0 sm:$0xff]  ;;  %v277_v39 = vld [vmem:[%s749_s5 + $0x8] sm:$0xff] }
  0x19   :  { %522 = vmatprep.subr.bf16.mxu1 %v521_v15  ;;  %v533_v24 = vpack.c.bf16 %v166_v23, %v165_v22  ;;  %v276_v38 = vld [vmem:[%s749_s5] sm:$0xff]  ;;  %v278_v41 = vld [vmem:[%s749_s5 + $0x10] sm:$0xff]  ;;  %v279_v42 = vld [vmem:[%s749_s5 + $0x18] sm:$0xff] }
  0x1a   :  { %516 = vmatpush3.bf16.msra.mxu0 %v513_v5  ;;  %524 = vmatpush3.bf16.msra.mxu1 %v521_v15  ;;  %v537_v40 = vpack.c.bf16 %v277_v39, %v276_v38  ;;  %v541_v43 = vpack.c.bf16 %v279_v42, %v278_v41  ;;  %v280_v44 = vld [vmem:[%s749_s5 + $0x20] sm:$0xff]  ;;  %v281_v45 = vld [vmem:[%s749_s5 + $0x28] sm:$0xff]  ;;  %v282_v47 = vld [vmem:[%s749_s5 + $0x30] sm:$0xff] }
  0x1b   :  { %518 = vmatprep.subr.bf16.mxu0 %v517_v9  ;;  %526 = vmatprep.subr.bf16.mxu1 %v525_v18  ;;  %v545_v46 = vpack.c.bf16 %v281_v45, %v280_v44  ;;  %v283_v48 = vld [vmem:[%s749_s5 + $0x38] sm:$0xff]  ;;  %v403_v50 = vld [vmem:[%s748_s4] ss:$0 sm:$0xff] }
  0x1c   :  { %v549_v49 = vpack.c.bf16 %v283_v48, %v282_v47  ;;  %v408_v63 = vld [vmem:[%s750_s6] ss:$0 sm:$0xff] }
  0x1e   :  { %520 = vmatpush3.bf16.msra.mxu0 %v517_v9  ;;  %528 = vmatpush3.bf16.msra.mxu1 %v525_v18 }
  0x1f   :  { %530 = vmatprep.subr.bf16.mxu1 %v529_v21  ;;  %538 = vmatprep.subr.bf16.mxu0 %v537_v40 }
  0x21   :  { %460 = vmatmul.mubr.msk.f32.vlgmr.msra.gmra.mrb[0].mxu0 %vm57_vm0, %v41_v10 }
  0x22   :  { %462 = vmatprep.mubr.msk.f32.mxu0 %vm57_vm0, %v42_v11  ;;  %532 = vmatpush3.bf16.msra.mxu1 %v529_v21 }
  0x23   :  { %534 = vmatprep.subr.bf16.mxu1 %v533_v24  ;;  %540 = vmatpush3.bf16.msra.mxu0 %v537_v40 }
  0x24   :  { %542 = vmatprep.subr.bf16.mxu0 %v541_v43 }
  0x25   :  { %463 = vmatmul.mubr.msk.f32.gmra.mrb[2].mxu0 %vm57_vm0, %v43_v12 }
  0x26   :  { %536 = vmatpush3.bf16.msra.mxu1 %v533_v24 }
  0x27   :  { %544 = vmatpush3.bf16.msra.mxu0 %v541_v43 }
  0x28   :  { %546 = vmatprep.subr.bf16.mxu0 %v545_v46 }
  0x2b   :  { %548 = vmatpush3.bf16.msra.mxu0 %v545_v46 }
  0x2c   :  { %550 = vmatprep.subr.bf16.mxu0 %v549_v49 }
  0x2f   :  { %552 = vmatpush3.bf16.msra.mxu0 %v549_v49 }
  0xf4   :  { %v461_v26 = vpop.f32.mrb[0].mxu0 }
  0xf5   :  { %v142_v27 = vadd.f32 %v461_v26, %v398_v25  ;;  %v136_v28 = vpop.f32.mrb[1].mxu0 }
  0xf6   :  { %v137_v29 = vadd.f32 %v398_v25, %v136_v28 }
  0xf8   :  { %556 = vtanh.f32 %v137_v29  ;;  %v464_v30 = vpop.f32.mrb[2].mxu0 }
  0xf9   :  { %558 = vtanh.f32 %v142_v27  ;;  %v152_v31 = vadd.f32 %v464_v30, %v398_v25  ;;  %v146_v32 = vpop.f32.mrb[3].mxu0 }
  0xfa   :  { %v147_v33 = vadd.f32 %v398_v25, %v146_v32 }
  0xfc   :  { %560 = vtanh.f32 %v147_v33 }
  0xfd   :  { %562 = vtanh.f32 %v152_v31 }
 0x102   :  { %v557_v34 = vpop.eup %556 }
 0x103   :  { %v559_v35 = vpop.eup %558  ;;  %481 = vmatprep.mubr.msk.f32.mxu1 %vm174_vm1, %v557_v34 }
 0x104   :  { %482 = vmatmul.mubr.msk.f32.vlgmr.msra.gmra.mrb[0].mxu1 %vm174_vm1, %v559_v35 }
 0x106   :  { %v561_v36 = vpop.eup %560 }
 0x107   :  { %v563_v37 = vpop.eup %562  ;;  %484 = vmatprep.mubr.msk.f32.mxu1 %vm174_vm1, %v561_v36 }
 0x108   :  { %485 = vmatmul.mubr.msk.f32.gmra.mrb[2].mxu1 %vm174_vm1, %v563_v37 }
 0x1d7   :  { %v483_v51 = vpop.f32.mrb[0].mxu1 }
 0x1d8   :  { %v259_v52 = vadd.f32 %v483_v51, %v403_v50  ;;  %v253_v53 = vpop.f32.mrb[1].mxu1 }
 0x1d9   :  { %v254_v54 = vadd.f32 %v403_v50, %v253_v53 }
 0x1db   :  { %564 = vtanh.f32 %v254_v54  ;;  %v486_v55 = vpop.f32.mrb[2].mxu1 }
 0x1dc   :  { %566 = vtanh.f32 %v259_v52  ;;  %v269_v56 = vadd.f32 %v486_v55, %v403_v50  ;;  %v263_v57 = vpop.f32.mrb[3].mxu1 }
 0x1dd   :  { %v264_v58 = vadd.f32 %v403_v50, %v263_v57 }
 0x1df   :  { %568 = vtanh.f32 %v264_v58 }
 0x1e0   :  { %570 = vtanh.f32 %v269_v56 }
 0x1e5   :  { %v565_v59 = vpop.eup %564 }
 0x1e6   :  { %v567_v60 = vpop.eup %566  ;;  %503 = vmatprep.mubr.msk.f32.mxu0 %vm174_vm1, %v565_v59 }
 0x1e7   :  { %504 = vmatmul.mubr.msk.f32.vlgmr.msra.gmra.mrb[4].mxu0 %vm174_vm1, %v567_v60 }
 0x1e9   :  { %v569_v61 = vpop.eup %568 }
 0x1ea   :  { %v571_v62 = vpop.eup %570  ;;  %506 = vmatprep.mubr.msk.f32.mxu0 %vm174_vm1, %v569_v61 }
 0x1eb   :  { %507 = vmatmul.mubr.msk.f32.gmra.mrb[6].mxu0 %vm174_vm1, %v571_v62 }
 0x2ba   :  { %v505_v0 = vpop.f32.mrb[4].mxu0 }
 0x2bb   :  { %v375_v1 = vadd.f32 %v505_v0, %v408_v63  ;;  %v369_v2 = vpop.f32.mrb[5].mxu0 }
 0x2bc   :  { %v370_v3 = vadd.f32 %v408_v63, %v369_v2 }
 0x2bd   :  { %390 = vst.msk [vmem:[%s751_s7 + $0x8] sm:$0xff] %vm388_vm2, %v375_v1 }
 0x2be   :  { %389 = vst.msk [vmem:[%s751_s7] sm:$0xff] %vm388_vm2, %v370_v3  ;;  %v508_v4 = vpop.f32.mrb[6].mxu0 }
 0x2bf   :  { %v385_v5 = vadd.f32 %v508_v4, %v408_v63  ;;  %v379_v6 = vpop.f32.mrb[7].mxu0 }
 0x2c0   :  { %v380_v7 = vadd.f32 %v408_v63, %v379_v6 }
 0x2c1   :  { %392 = vst.msk [vmem:[%s751_s7 + $0x18] sm:$0xff] %vm388_vm2, %v385_v5 }
 0x2c2   :  { %391 = vst.msk [vmem:[%s751_s7 + $0x10] sm:$0xff] %vm388_vm2, %v380_v7 }
 0x2c3   :  { %397 = vsyncpa [#allocation3], 1 }

</bundles_post_ra>
